<compile_context>
chip_gen: v6e
topology: v6e:2x2x1
jax: 0.10.0
libtpu: 0.0.40
codegen_flags: <defaults>
</compile_context>

<pallas_src>
import jax
import jax.numpy as jnp
from jax.experimental import pallas as pl
from jax.experimental.pallas import tpu as pltpu

K_IN = 784     # fc1 input features (fed un-padded; block dim == full array dim)
H = 128        # fc1 out / fc2 in features (lane-aligned)
N_OUT = 10     # fc2 real output features
N_PAD = 128    # lane-dense padded output width
MIN_TM = 128   # don't shrink tiles below this unless the batch itself is tiny


def _round_up(x, m):
    return (x + m - 1) // m * m


def mlp_kernel(x_ref, w1_ref, b1_ref, w2_ref, b2_ref, o_ref):
    # x arrives as f32 straight from HBM; cast to bf16 for the MXU here
    # (VPU op, hidden under the DMA of the next tile).
    x = x_ref[...].astype(jnp.bfloat16)                               # (TM, 784)
    h = jnp.dot(x, w1_ref[...], preferred_element_type=jnp.float32)   # (TM, 128) f32
    h = jnp.maximum(h + b1_ref[...], 0.0)                             # bias + ReLU (VPU, f32)
    y = jnp.dot(h.astype(jnp.bfloat16), w2_ref[...],
                preferred_element_type=jnp.float32)                   # (TM, 128) f32
    o_ref[...] = (y + b2_ref[...]).astype(o_ref.dtype)                # lane-dense store


def prepare_params(w1_t, b1, w2_t, b2):
    """One-time parameter prep (hoisted out of the per-call path).

    w1_t: (784, 128) f32 (transposed PyTorch fc1.weight)  -> bf16
    b1:   (128,) f32                                        -> (1, 128) f32
    w2_t: (128, 10) f32 (transposed PyTorch fc2.weight)     -> (128, 128) bf16, zero-padded
    b2:   (10,) f32                                          -> (1, 128) f32, zero-padded
    """
    w1_p = w1_t.astype(jnp.bfloat16)
    b1_p = b1.reshape(1, H).astype(jnp.float32)
    w2_p = jnp.zeros((H, N_PAD), jnp.bfloat16).at[:, :N_OUT].set(
        w2_t.astype(jnp.bfloat16))
    b2_p = jnp.zeros((1, N_PAD), jnp.float32).at[0, :N_OUT].set(
        b2.astype(jnp.float32))
    return w1_p, b1_p, w2_p, b2_p


def _choose_tile(batch, tm):
    """Batch tile: multiple of 16 (bf16 sublane packing), capped for tiny
    batches, and kept small enough that the grid has >= 2 steps when the
    batch allows (so v7x's 2 TensorCores both get work)."""
    tm_eff = min(tm, _round_up(batch, 16))
    if batch >= 2 * MIN_TM and -(-batch // tm_eff) < 2:
        tm_eff = max(MIN_TM, _round_up(-(-batch // 2), 16))
    return tm_eff


def simple_nn_forward_padded(x, prepared, *, tm=1024):
    """Fused SimpleNN forward.

    x: (B, 784) f32. Returns the lane-dense padded logits (b_pad, 128) f32;
    real logits are [:B, :10]. Slicing is left to the caller so it can be
    fused into the consumer instead of paying a separate copy pass.

    Note: tm > ~1024 needs vmem_limit_bytes raised on v5e (16 MiB default
    scoped VMEM); tm=1024 fits double-buffered on every generation.
    """
    w1_p, b1_p, w2_p, b2_p = prepared
    B = x.shape[0]
    tm_eff = _choose_tile(B, tm)
    b_pad = _round_up(B, tm_eff)
    grid = (b_pad // tm_eff,)

    # Only pad the batch dim, and only when it doesn't divide the tile.
    # No K padding and no dtype conversion pass over x in HBM.
    if b_pad != B:
        x = jnp.pad(x, ((0, b_pad - B), (0, 0)))

    flops = 2 * b_pad * (K_IN * H + H * N_PAD)
    bytes_accessed = (b_pad * K_IN * 4          # x (f32, dominant stream)
                      + K_IN * H * 2            # w1 (bf16)
                      + H * N_PAD * 2           # w2 (bf16)
                      + (H + N_PAD) * 4         # biases (f32)
                      + b_pad * N_PAD * 4)      # out (f32)

    return pl.pallas_call(
        mlp_kernel,
        out_shape=jax.ShapeDtypeStruct((b_pad, N_PAD), jnp.float32),
        grid_spec=pltpu.PrefetchScalarGridSpec(
            num_scalar_prefetch=0,
            grid=grid,
            in_specs=[
                # x: streamed batch tiles; last block dim == full array dim
                # (784), so no lane padding materialized in HBM.
                pl.BlockSpec((tm_eff, K_IN), lambda i: (i, 0)),
                pl.BlockSpec((K_IN, H), lambda i: (0, 0)),        # w1: resident
                pl.BlockSpec((1, H), lambda i: (0, 0)),           # b1: resident
                pl.BlockSpec((H, N_PAD), lambda i: (0, 0)),       # w2: resident
                pl.BlockSpec((1, N_PAD), lambda i: (0, 0)),       # b2: resident
            ],
            out_specs=pl.BlockSpec((tm_eff, N_PAD), lambda i: (i, 0)),
        ),
        compiler_params=pltpu.CompilerParams(
            dimension_semantics=("parallel",),
        ),
        cost_estimate=pl.CostEstimate(
            flops=flops, transcendentals=0, bytes_accessed=bytes_accessed),
    )(x, w1_p, b1_p, w2_p, b2_p)


def simple_nn_forward(x, w1_t, b1, w2_t, b2, *, tm=1024):
    """Convenience wrapper matching the PyTorch module's signature/semantics:
    returns (B, 10) f32 logits == F.relu(x @ W1.T + b1) @ W2.T + b2."""
    prepared = prepare_params(w1_t, b1, w2_t, b2)
    out_padded = simple_nn_forward_padded(x, prepared, tm=tm)
    return out_padded[:x.shape[0], :N_OUT]


def init_params(key):
    """PyTorch nn.Linear-style init; weights kept transposed (in, out)."""
    k1, k2, k3, k4 = jax.random.split(key, 4)
    lim1 = 1.0 / jnp.sqrt(784.0)
    lim2 = 1.0 / jnp.sqrt(128.0)
    w1_t = jax.random.uniform(k1, (784, 128), jnp.float32, -lim1, lim1)
    b1 = jax.random.uniform(k2, (128,), jnp.float32, -lim1, lim1)
    w2_t = jax.random.uniform(k3, (128, 10), jnp.float32, -lim2, lim2)
    b2 = jax.random.uniform(k4, (10,), jnp.float32, -lim2, lim2)
    return w1_t, b1, w2_t, b2


if __name__ == "__main__":
    key = jax.random.PRNGKey(0)
    k_params, k_x = jax.random.split(key)
    w1_t, b1, w2_t, b2 = init_params(k_params)

    B = 8  # small demo batch (real workloads should batch >= 256 rows)
    x = jax.random.normal(k_x, (B, 784), jnp.float32)

    out = simple_nn_forward(x, w1_t, b1, w2_t, b2)
    out = jax.block_until_ready(out)

    # Plain-JAX f32 reference (same math as the PyTorch module).
    ref = jnp.maximum(x @ w1_t + b1, 0.0) @ w2_t + b2
    assert out.shape == (B, 10)
    # bf16 MXU inputs (f32 accumulation) -> loosened tolerance vs f32 ref.
    assert jnp.allclose(out, ref, atol=5e-2, rtol=5e-2), (
        float(jnp.max(jnp.abs(out - ref))))

    print("KERNEL_OK")
</pallas_src>

<mosaic_0001>
module attributes {stable_mosaic.version = 11 : i64} {
  func.func @mlp_kernel(%arg0: i32, %arg1: memref<16x784xf32, #tpu.memory_space<vmem>>, %arg2: memref<784x128xbf16, #tpu.memory_space<vmem>>, %arg3: memref<1x128xf32, #tpu.memory_space<vmem>>, %arg4: memref<128x128xbf16, #tpu.memory_space<vmem>>, %arg5: memref<1x128xf32, #tpu.memory_space<vmem>>, %arg6: memref<16x128xf32, #tpu.memory_space<vmem>>) attributes {dimension_semantics = [#tpu.dimension_semantics<parallel>], iteration_bounds = array<i64: 1>, scalar_prefetch = 0 : i64, scratch_operands = 0 : i64, tpu.core_type = #tpu.core_type<tc>, window_params = [{transform_indices = @transform_0, window_bounds = array<i64: 16, 784>}, {pipeline_mode = #tpu.pipeline_mode<synchronous>, transform_indices = @transform_1, window_bounds = array<i64: 784, 128>}, {pipeline_mode = #tpu.pipeline_mode<synchronous>, transform_indices = @transform_2, window_bounds = array<i64: 1, 128>}, {pipeline_mode = #tpu.pipeline_mode<synchronous>, transform_indices = @transform_3, window_bounds = array<i64: 128, 128>}, {pipeline_mode = #tpu.pipeline_mode<synchronous>, transform_indices = @transform_4, window_bounds = array<i64: 1, 128>}, {transform_indices = @transform_5, window_bounds = array<i64: 16, 128>}]} {
    %c0 = arith.constant 0 : index
    %c0_0 = arith.constant 0 : index
    %0 = vector.load %arg1[%c0, %c0_0] : memref<16x784xf32, #tpu.memory_space<vmem>>, vector<16x784xf32>
    %1 = arith.truncf %0 : vector<16x784xf32> to vector<16x784xbf16>
    %c0_1 = arith.constant 0 : index
    %c0_2 = arith.constant 0 : index
    %2 = vector.load %arg2[%c0_1, %c0_2] : memref<784x128xbf16, #tpu.memory_space<vmem>>, vector<784x128xbf16>
    %cst = arith.constant dense<0.000000e+00> : vector<16x128xf32>
    %3 = tpu.matmul %1, %2, %cst {dimension_numbers = #tpu.dot_dimension_numbers<[1], [0], [0], [1], [0, 0, 1, 1], [], []>} : vector<16x784xbf16>, vector<784x128xbf16>, vector<16x128xf32> -> vector<16x128xf32>
    %c0_3 = arith.constant 0 : index
    %c0_4 = arith.constant 0 : index
    %4 = vector.load %arg3[%c0_3, %c0_4] : memref<1x128xf32, #tpu.memory_space<vmem>>, vector<1x128xf32>
    %5 = vector.broadcast %4 : vector<1x128xf32> to vector<16x128xf32>
    %6 = arith.addf %3, %5 : vector<16x128xf32>
    %cst_5 = arith.constant 0.000000e+00 : f32
    %7 = vector.broadcast %cst_5 : f32 to vector<16x128xf32>
    %8 = arith.maximumf %6, %7 : vector<16x128xf32>
    %9 = arith.truncf %8 : vector<16x128xf32> to vector<16x128xbf16>
    %c0_6 = arith.constant 0 : index
    %c0_7 = arith.constant 0 : index
    %10 = vector.load %arg4[%c0_6, %c0_7] : memref<128x128xbf16, #tpu.memory_space<vmem>>, vector<128x128xbf16>
    %cst_8 = arith.constant dense<0.000000e+00> : vector<16x128xf32>
    %11 = tpu.matmul %9, %10, %cst_8 {dimension_numbers = #tpu.dot_dimension_numbers<[1], [0], [0], [1], [0, 0, 1, 1], [], []>} : vector<16x128xbf16>, vector<128x128xbf16>, vector<16x128xf32> -> vector<16x128xf32>
    %c0_9 = arith.constant 0 : index
    %c0_10 = arith.constant 0 : index
    %12 = vector.load %arg5[%c0_9, %c0_10] : memref<1x128xf32, #tpu.memory_space<vmem>>, vector<1x128xf32>
    %13 = vector.broadcast %12 : vector<1x128xf32> to vector<16x128xf32>
    %14 = arith.addf %11, %13 : vector<16x128xf32>
    %c0_11 = arith.constant 0 : index
    %c0_12 = arith.constant 0 : index
    %15 = vector.load %arg6[%c0_11, %c0_12] : memref<16x128xf32, #tpu.memory_space<vmem>>, vector<16x128xf32>
    tpu.vector_store %arg6[%c0_11, %c0_12], %14 {strides = array<i32>} : memref<16x128xf32, #tpu.memory_space<vmem>>, vector<16x128xf32>,
    return
  }
  func.func @transform_0(%arg0: i32) -> (i32, i32) {
    %c0_i32 = arith.constant 0 : i32
    %c0_i32_0 = arith.constant 0 : i32
    return %arg0, %c0_i32 : i32, i32
  }
  func.func @transform_1(%arg0: i32) -> (i32, i32) {
    %c0_i32 = arith.constant 0 : i32
    %c0_i32_0 = arith.constant 0 : i32
    %c0_i32_1 = arith.constant 0 : i32
    return %c0_i32, %c0_i32_0 : i32, i32
  }
  func.func @transform_2(%arg0: i32) -> (i32, i32) {
    %c0_i32 = arith.constant 0 : i32
    %c0_i32_0 = arith.constant 0 : i32
    %c0_i32_1 = arith.constant 0 : i32
    return %c0_i32, %c0_i32_0 : i32, i32
  }
  func.func @transform_3(%arg0: i32) -> (i32, i32) {
    %c0_i32 = arith.constant 0 : i32
    %c0_i32_0 = arith.constant 0 : i32
    %c0_i32_1 = arith.constant 0 : i32
    return %c0_i32, %c0_i32_0 : i32, i32
  }
  func.func @transform_4(%arg0: i32) -> (i32, i32) {
    %c0_i32 = arith.constant 0 : i32
    %c0_i32_0 = arith.constant 0 : i32
    %c0_i32_1 = arith.constant 0 : i32
    return %c0_i32, %c0_i32_0 : i32, i32
  }
  func.func @transform_5(%arg0: i32) -> (i32, i32) {
    %c0_i32 = arith.constant 0 : i32
    %c0_i32_0 = arith.constant 0 : i32
    return %arg0, %c0_i32 : i32, i32
  }
}

</mosaic_0001>

<bundles_post_ra>
// kernel: tpu_custom_call.1
= control target key start
LH: loop header
LB: loop body
LE: loop exit
PB: predicated region body
PF: predicated region fallthrough
CT: control target
= control target key end

     0   :  { %10 = vsyncpa [#allocation3], 0  ;;  %s1177_s0 = inlined_call_operand.hbm [shape: f32[16,784], index: 0, kind: input, shape index: {}]   ;;  %s1178_s1 = inlined_call_operand.hbm [shape: bf16[784,128], index: 1, kind: input, shape index: {}]   ;;  %s1179_s2 = inlined_call_operand.vmem [shape: f32[1,128], index: 2, kind: input, shape index: {}]   ;;  %s1180_s3 = inlined_call_operand.hbm [shape: bf16[128,128], index: 3, kind: input, shape index: {}]   ;;  %s1181_s4 = inlined_call_operand.vmem [shape: f32[1,128], index: 4, kind: input, shape index: {}]   ;;  %s1182_s5 = inlined_call_operand.hbm [shape: f32[16,128], index: 5, kind: output, shape index: {}]  }
   0x1   :  { %11 = vsyncpa [#allocation6], 0 }
   0x2   :  { %12 = vsyncpa [#allocation4], 0  ;;  %s1104_s18 = smov [#allocation5]  }
   0x3   :  { %s30_s19 = sshll.u32 %s1104_s18, 4  ;;  %s31_s19 = int_to_ptr.vmem [resolvable:$true] %s30_s19 }
   0x4   :  { %s1026_s20 = scalar_lea.vmem %s31_s19, 6272  ;;  %p1031_p1 = scmp.lt.s32.totalorder %s31_s19, %s31_s19 }
   0x5   :  { %p1027_p0 = scmp.ne.s32.totalorder %s31_s19, %s1026_s20  ;;  %p1032_p2 = scmp.lt.s32.totalorder %s1026_s20, %s1026_s20 }
   0x7   :  { %p1033_p3 = por %p1032_p2, %p1031_p1 }
   0x9   :  { %p1034_p4 = pnand %p1033_p3, %p1027_p0 }
   0xb   :  { %1037 = shalt.err (!%p1034_p4)
}
   0xc   :  { %s1105_s21 = smov 64   ;;  %s1106_s22 = smov 4  }
   0xd   :  { %36 = dma.hbm_to_vmem [thread:$0]  %s1178_s1, 6272, %s31_s19, [#allocation6], %s1105_s21, %s1105_s21, %s1106_s22  }
   0xe   :  { %s1107_s25 = smov [#allocation2]  }
   0xf   :  { %s18_s26 = sshll.u32 %s1107_s25, 4  ;;  %s19_s26 = int_to_ptr.vmem [resolvable:$true] %s18_s26 }
  0x10   :  { %s1046_s27 = scalar_lea.vmem %s19_s26, 1792  ;;  %p1051_p6 = scmp.lt.s32.totalorder %s19_s26, %s19_s26 }
  0x11   :  { %p1047_p5 = scmp.ne.s32.totalorder %s19_s26, %s1046_s27  ;;  %p1052_p7 = scmp.lt.s32.totalorder %s1046_s27, %s1046_s27 }
  0x13   :  { %p1053_p8 = por %p1052_p7, %p1051_p6 }
  0x15   :  { %p1054_p9 = pnand %p1053_p8, %p1047_p5 }
  0x17   :  { %1057 = shalt.err (!%p1054_p9)
}
  0x18   :  { %s1108_s28 = smov 896   ;;  %s1109_s29 = smov 56  }
  0x19   :  { %24 = dma.hbm_to_vmem [thread:$0]  %s1177_s0, 1792, %s19_s26, [#allocation3], %s1108_s28, %s1108_s28, %s1109_s29  }
  0x1a   :  { %s1110_s7 = smov [#allocation7]  }
  0x1b   :  { %s44_s8 = sshll.u32 %s1110_s7, 4  ;;  %s45_s8 = int_to_ptr.vmem [resolvable:$true] %s44_s8 }
  0x1c   :  { %s1066_s1 = scalar_lea.vmem %s45_s8, 1024  ;;  %p1071_p11 = scmp.lt.s32.totalorder %s45_s8, %s45_s8 }
  0x1d   :  { %p1067_p10 = scmp.ne.s32.totalorder %s45_s8, %s1066_s1  ;;  %p1072_p12 = scmp.lt.s32.totalorder %s1066_s1, %s1066_s1 }
  0x1f   :  { %p1073_p13 = por %p1072_p12, %p1071_p11 }
  0x21   :  { %p1074_p0 = pnand %p1073_p13, %p1067_p10 }
  0x23   :  { %1077 = shalt.err (!%p1074_p0)
}
  0x24   :  { %50 = dma.hbm_to_vmem [thread:$0]  %s1180_s3, 1024, %s45_s8, [#allocation6], %s1105_s21, %s1105_s21, %s1106_s22  }
  0x25   :  { %1098 = dma.done.wait [#allocation3], 1792  }
  0x26   :  { %1099 = vsyncadd [#allocation3], 4294965504 }
  0x27   :  { %1100 = dma.done.wait [#allocation6], 7296  }
  0x28   :  { %1101 = vsyncadd [#allocation6], 4294960000  ;;  %v961_v0 = vld [vmem:[#allocation5 + $0x78] sm:$0xff]   ;;  %v965_v4 = vld [vmem:[#allocation5 + $0x70] sm:$0xff]   ;;  %v1111_v43 = vmov 0.0   ;;  %vm1112_vm0 = vmmov 0  }
  0x29   :  { %v962_v1 = vld [vmem:[#allocation5 + $0x38] sm:$0xff]   ;;  %846 = vmatprep.subr.bf16.mxu0 %v961_v0  ;;  %v966_v5 = vld [vmem:[#allocation5 + $0x30] sm:$0xff]   ;;  %v969_v8 = vld [vmem:[#allocation5 + $0x68] sm:$0xff]   ;;  %vm483_vm1 = vcmask 130048   ;;  %s1113_s12 = smov [#allocation8]  }
  0x2a   :  { %v963_v2 = vld [vmem:[#allocation5 + $0xf8] sm:$0xff]   ;;  %847 = vmatpush3.bf16.msra.mxu0 %v962_v1  ;;  %v967_v6 = vld [vmem:[#allocation5 + $0xf0] sm:$0xff]   ;;  %v970_v9 = vld [vmem:[#allocation5 + $0x28] sm:$0xff]   ;;  %s773_s13 = sshll.u32 %s1113_s12, 4  ;;  %s774_s13 = int_to_ptr.vmem [resolvable:$true] %s773_s13 }
  0x2b   :  { %v964_v3 = vld [vmem:[#allocation5 + $0xb8] sm:$0xff]   ;;  %868 = vmatprep.subr.bf16.mxu1 %v963_v2  ;;  %848 = vmatprep.subr.bf16.mxu0 %v965_v4  ;;  %v968_v7 = vld [vmem:[#allocation5 + $0xb0] sm:$0xff]   ;;  %v971_v10 = vld [vmem:[#allocation5 + $0xe8] sm:$0xff]   ;;  %s1078_s14 = scalar_lea.vmem %s774_s13, 256  ;;  %p1083_p2 = scmp.lt.s32.totalorder %s774_s13, %s774_s13 }
  0x2c   :  { %869 = vmatpush3.bf16.msra.mxu1 %v964_v3  ;;  %v972_v11 = vld [vmem:[#allocation5 + $0xa8] sm:$0xff]   ;;  %v973_v12 = vld [vmem:[#allocation5 + $0x60] sm:$0xff]   ;;  %v977_v16 = vld [vmem:[#allocation5 + $0x58] sm:$0xff]   ;;  %p1079_p1 = scmp.ne.s32.totalorder %s774_s13, %s1078_s14  ;;  %p1084_p3 = scmp.lt.s32.totalorder %s1078_s14, %s1078_s14 }
  0x2d   :  { %870 = vmatprep.subr.bf16.mxu1 %v967_v6  ;;  %v974_v13 = vld [vmem:[#allocation5 + $0x20] sm:$0xff]   ;;  %v978_v17 = vld [vmem:[#allocation5 + $0x18] sm:$0xff]   ;;  %v981_v20 = vld [vmem:[#allocation5 + $0x50] sm:$0xff]  }
  0x2e   :  { %849 = vmatpush3.bf16.msra.mxu0 %v966_v5  ;;  %v975_v14 = vld [vmem:[#allocation5 + $0xe0] sm:$0xff]   ;;  %v979_v18 = vld [vmem:[#allocation5 + $0xd8] sm:$0xff]   ;;  %v982_v21 = vld [vmem:[#allocation5 + $0x10] sm:$0xff]   ;;  %p1085_p4 = por %p1084_p3, %p1083_p2 }
  0x2f   :  { %850 = vmatprep.subr.bf16.mxu0 %v969_v8  ;;  %v976_v15 = vld [vmem:[#allocation5 + $0xa0] sm:$0xff]   ;;  %v980_v19 = vld [vmem:[#allocation5 + $0x98] sm:$0xff]   ;;  %v983_v22 = vld [vmem:[#allocation5 + $0xd0] sm:$0xff]  }
  0x30   :  { %871 = vmatpush3.bf16.msra.mxu1 %v968_v7  ;;  %v984_v23 = vld [vmem:[#allocation5 + $0x90] sm:$0xff]   ;;  %v985_v24 = vld [vmem:[#allocation5 + $0x48] sm:$0xff]   ;;  %v989_v28 = vld [vmem:[#allocation5 + $0x40] sm:$0xff]   ;;  %p1086_p5 = pnand %p1085_p4, %p1079_p1 }
  0x31   :  { %872 = vmatprep.subr.bf16.mxu1 %v971_v10  ;;  %v986_v25 = vld [vmem:[#allocation5 + $0x8] sm:$0xff]   ;;  %v990_v29 = vld [vmem:[#allocation5] sm:$0xff]   ;;  %v64_v31 = vld [vmem:[#allocation2 + $0x8] sm:$0xff] }
  0x32   :  { %851 = vmatpush3.bf16.msra.mxu0 %v970_v9  ;;  %v987_v26 = vld [vmem:[#allocation5 + $0xc8] sm:$0xff]   ;;  %v991_v30 = vld [vmem:[#allocation5 + $0xc0] sm:$0xff]   ;;  %v71_v32 = vld [vmem:[#allocation2 + $0x40] sm:$0xff] }
  0x33   :  { %852 = vmatprep.subr.bf16.mxu0 %v973_v12  ;;  %v988_v27 = vld [vmem:[#allocation5 + $0x88] sm:$0xff]   ;;  %v78_v33 = vpack.c.bf16 %v71_v32, %v64_v31  ;;  %v992_v34 = vld [vmem:[#allocation5 + $0x80] sm:$0xff]   ;;  %v63_v35 = vld [vmem:[#allocation2] sm:$0xff] }
  0x34   :  { %873 = vmatpush3.bf16.msra.mxu1 %v972_v11  ;;  %v70_v36 = vld [vmem:[#allocation2 + $0x38] sm:$0xff]  ;;  %v993_v38 = vld [vmem:[#allocation5 + $0x178] sm:$0xff]   ;;  %v73_v40 = vld [vmem:[#allocation2 + $0x50] sm:$0xff] }
  0x35   :  { %874 = vmatprep.subr.bf16.mxu1 %v975_v14  ;;  %519 = vmatprep.mubr.bf16.mxu0 %v78_v33  ;;  %v77_v37 = vpack.c.bf16 %v70_v36, %v63_v35  ;;  %v66_v39 = vld [vmem:[#allocation2 + $0x18] sm:$0xff]  ;;  %v994_v42 = vld [vmem:[#allocation5 + $0x138] sm:$0xff]   ;;  %v65_v44 = vld [vmem:[#allocation2 + $0x10] sm:$0xff] }
  0x36   :  { %853 = vmatpush3.bf16.msra.mxu0 %v974_v13  ;;  %v80_v41 = vpack.c.bf16 %v73_v40, %v66_v39  ;;  %v72_v45 = vld [vmem:[#allocation2 + $0x48] sm:$0xff]  ;;  %v995_v47 = vld [vmem:[#allocation5 + $0x170] sm:$0xff]   ;;  %v997_v49 = vld [vmem:[#allocation5 + $0x168] sm:$0xff]  }
  0x37   :  { %854 = vmatprep.subr.bf16.mxu0 %v977_v16  ;;  %v79_v46 = vpack.c.bf16 %v72_v45, %v65_v44  ;;  %v996_v48 = vld [vmem:[#allocation5 + $0x130] sm:$0xff]   ;;  %v998_v50 = vld [vmem:[#allocation5 + $0x128] sm:$0xff]   ;;  %v999_v51 = vld [vmem:[#allocation5 + $0x160] sm:$0xff]  }
  0x38   :  { %875 = vmatpush3.bf16.msra.mxu1 %v976_v15  ;;  %560 = vmatprep.mubr.bf16.mxu1 %v80_v41  ;;  %v1000_v52 = vld [vmem:[#allocation5 + $0x120] sm:$0xff]   ;;  %v1001_v53 = vld [vmem:[#allocation5 + $0x158] sm:$0xff]   ;;  %v1003_v55 = vld [vmem:[#allocation5 + $0x150] sm:$0xff]  }
  0x39   :  { %876 = vmatprep.subr.bf16.mxu1 %v979_v18  ;;  %v1002_v54 = vld [vmem:[#allocation5 + $0x118] sm:$0xff]   ;;  %v1009_v56 = vld [vmem:[#allocation5 + $0x180] sm:$0xff]   ;;  %v1004_v58 = vld [vmem:[#allocation5 + $0x110] sm:$0xff]  }
  0x3a   :  { %855 = vmatpush3.bf16.msra.mxu0 %v978_v17  ;;  %v68_v57 = vld [vmem:[#allocation2 + $0x28] sm:$0xff]  ;;  %v1005_v59 = vld [vmem:[#allocation5 + $0x148] sm:$0xff]   ;;  %v75_v60 = vld [vmem:[#allocation2 + $0x60] sm:$0xff] }
  0x3b   :  { %856 = vmatprep.subr.bf16.mxu0 %v981_v20  ;;  %v82_v61 = vpack.c.bf16 %v75_v60, %v68_v57  ;;  %v69_v62 = vld [vmem:[#allocation2 + $0x30] sm:$0xff]  ;;  %v76_v63 = vld [vmem:[#allocation2 + $0x68] sm:$0xff]  ;;  %v1006_v1 = vld [vmem:[#allocation5 + $0x108] sm:$0xff]  }
  0x3c   :  { %877 = vmatpush3.bf16.msra.mxu1 %v980_v19  ;;  %v83_v0 = vpack.c.bf16 %v76_v63, %v69_v62  ;;  %v1007_v2 = vld [vmem:[#allocation5 + $0x140] sm:$0xff]   ;;  %v67_v4 = vld [vmem:[#allocation2 + $0x20] sm:$0xff]  ;;  %v74_v5 = vld [vmem:[#allocation2 + $0x58] sm:$0xff] }
  0x3d   :  { %878 = vmatprep.subr.bf16.mxu1 %v983_v22  ;;  %v1008_v3 = vld [vmem:[#allocation5 + $0x100] sm:$0xff]   ;;  %v81_v6 = vpack.c.bf16 %v74_v5, %v67_v4  ;;  %v1011_v8 = vld [vmem:[#allocation7 + $0x30] sm:$0xff]   ;;  %v1012_v9 = vld [vmem:[#allocation7 + $0x28] sm:$0xff]  }
  0x3e   :  { %857 = vmatpush3.bf16.msra.mxu0 %v982_v21  ;;  %v1010_v7 = vld [vmem:[#allocation7 + $0x38] sm:$0xff]   ;;  %v1013_v10 = vld [vmem:[#allocation7 + $0x20] sm:$0xff]   ;;  %v1015_v12 = vld [vmem:[#allocation7 + $0x10] sm:$0xff]  }
  0x3f   :  { %858 = vmatprep.subr.bf16.mxu0 %v985_v24  ;;  %v1014_v11 = vld [vmem:[#allocation7 + $0x18] sm:$0xff]   ;;  %v1016_v13 = vld [vmem:[#allocation7 + $0x8] sm:$0xff]   ;;  %v1017_v14 = vld [vmem:[#allocation7] sm:$0xff]  }
  0x40   :  { %879 = vmatpush3.bf16.msra.mxu1 %v984_v23 }
  0x41   :  { %880 = vmatprep.subr.bf16.mxu1 %v987_v26 }
  0x42   :  { %859 = vmatpush3.bf16.msra.mxu0 %v986_v25 }
  0x43   :  { %860 = vmatprep.subr.bf16.mxu0 %v989_v28 }
  0x44   :  { %881 = vmatpush3.bf16.msra.mxu1 %v988_v27  ;;  %v786_v27 = vld [vmem:[%s1179_s2] ss:$0 sm:$0xff] }
  0x45   :  { %882 = vmatprep.subr.bf16.mxu1 %v991_v30 }
  0x46   :  { %861 = vmatpush3.bf16.msra.mxu0 %v990_v29 }
  0x47   :  { %890 = vmatprep.subr.bf16.mxu0 %v993_v38 }
  0x48   :  { %883 = vmatpush3.bf16.msra.mxu1 %v992_v34 }
  0x49   :  { %923 = vmatprep.subr.bf16.mxu1 %v1111_v43  ;;  %520 = vmatmul.mubr.bf16.vlgmr.msra.gmra.mxu0 %v77_v37 }
  0x4a   :  { %891 = vmatpush3.bf16.msra.mxu0 %v994_v42  ;;  %601 = vmatprep.mubr.bf16.mxu0 %v82_v61 }
  0x4b   :  { %561 = vmatmul.mubr.bf16.vlgmr.msra.gmra.mxu1 %v79_v46  ;;  %892 = vmatprep.subr.bf16.mxu0 %v995_v47 }
  0x4c   :  { %925 = vmatprep.mubr.msk.bf16.mxu1 %vm1112_vm0, %v1111_v43  ;;  %924 = vmatpush3.bf16.msra.mxu1 %v1009_v56 }
  0x4d   :  { %929 = vmatprep.subr.bf16.mxu1 %v1111_v43 }
  0x4e   :  { %893 = vmatpush3.bf16.msra.mxu0 %v996_v48 }
  0x4f   :  { %894 = vmatprep.subr.bf16.mxu0 %v997_v49  ;;  %v837_v49 = vld [vmem:[%s1181_s4] ss:$0 sm:$0xff] }
  0x52   :  { %895 = vmatpush3.bf16.msra.mxu0 %v998_v50 }
  0x53   :  { %896 = vmatprep.subr.bf16.mxu0 %v999_v51  ;;  %926 = vmatmul.mubr.msk.bf16.vlgmr.msra.gmra.mxu1 %vm483_vm1, %v83_v0 }
  0x54   :  { %945 = vmatprep.mubr.msk.bf16.mxu1 %vm1112_vm0, %v1111_v43  ;;  %930 = vmatpush3.bf16.msra.mxu1 %v1010_v7 }
  0x55   :  { %931 = vmatprep.subr.bf16.mxu1 %v1111_v43 }
  0x56   :  { %897 = vmatpush3.bf16.msra.mxu0 %v1000_v52 }
  0x57   :  { %898 = vmatprep.subr.bf16.mxu0 %v1001_v53 }
  0x58   :  { %932 = vmatpush3.bf16.msra.mxu1 %v1011_v8 }
  0x59   :  { %933 = vmatprep.subr.bf16.mxu1 %v1111_v43 }
  0x5a   :  { %899 = vmatpush3.bf16.msra.mxu0 %v1002_v54 }
  0x5b   :  { %900 = vmatprep.subr.bf16.mxu0 %v1003_v55 }
  0x5c   :  { %934 = vmatpush3.bf16.msra.mxu1 %v1012_v9 }
  0x5d   :  { %935 = vmatprep.subr.bf16.mxu1 %v1111_v43 }
  0x5e   :  { %901 = vmatpush3.bf16.msra.mxu0 %v1004_v58 }
  0x5f   :  { %902 = vmatprep.subr.bf16.mxu0 %v1005_v59 }
  0x60   :  { %936 = vmatpush3.bf16.msra.mxu1 %v1013_v10 }
  0x61   :  { %937 = vmatprep.subr.bf16.mxu1 %v1111_v43 }
  0x62   :  { %903 = vmatpush3.bf16.msra.mxu0 %v1006_v1 }
  0x63   :  { %904 = vmatprep.subr.bf16.mxu0 %v1007_v2 }
  0x64   :  { %938 = vmatpush3.bf16.msra.mxu1 %v1014_v11 }
  0x65   :  { %939 = vmatprep.subr.bf16.mxu1 %v1111_v43 }
  0x66   :  { %905 = vmatpush3.bf16.msra.mxu0 %v1008_v3 }
  0x68   :  { %940 = vmatpush3.bf16.msra.mxu1 %v1015_v12 }
  0x69   :  { %602 = vmatmul.mubr.bf16.vlgmr.msra.gmra.mxu0 %v81_v6  ;;  %941 = vmatprep.subr.bf16.mxu1 %v1111_v43 }
  0x6c   :  { %942 = vmatpush3.bf16.msra.mxu1 %v1016_v13 }
  0x6d   :  { %943 = vmatprep.subr.bf16.mxu1 %v1111_v43 }
  0x70   :  { %944 = vmatpush3.bf16.msra.mxu1 %v1017_v14 }
 0x109   :  { %v862_v18 = vpop.f32.mrf.mxu0 }
 0x10b   :  { %v884_v15 = vpop.f32.mrf.mxu1  ;;  %v863_v20 = vpop.f32.mrf.mxu0 }
 0x10c   :  { %v864_v26 = vadd.f32 %v863_v20, %v862_v18 }
 0x10d   :  { %v885_v16 = vpop.f32.mrf.mxu1  ;;  %v865_v23 = vpop.f32.mrf.mxu0 }
 0x10e   :  { %v522_v29 = vadd.f32 %v864_v26, %v786_v27  ;;  %v886_v30 = vadd.f32 %v885_v16, %v884_v15 }
 0x10f   :  { %v887_v17 = vpop.f32.mrf.mxu1  ;;  %v866_v28 = vpop.f32.mrf.mxu0 }
 0x110   :  { %v867_v31 = vadd.f32 %v866_v28, %v865_v23  ;;  %v563_v34 = vadd.f32 %v886_v30, %v522_v29 }
 0x111   :  { %v888_v19 = vpop.f32.mrf.mxu1 }
 0x112   :  { %v525_v35 = vadd.f32 %v867_v31, %v786_v27  ;;  %v889_v36 = vadd.f32 %v888_v19, %v887_v17 }
 0x113   :  { %v644_v21 = vpop.f32.mrf.mxu1 }
 0x114   :  { %v566_v41 = vadd.f32 %v889_v36, %v525_v35 }
 0x115   :  { %v927_v22 = vpop.f32.mrf.mxu1 }
 0x117   :  { %v647_v24 = vpop.f32.mrf.mxu1 }
 0x119   :  { %v928_v25 = vpop.f32.mrf.mxu1 }
 0x129   :  { %v906_v32 = vpop.f32.mrf.mxu0 }
 0x12b   :  { %v907_v33 = vpop.f32.mrf.mxu0 }
 0x12c   :  { %v908_v37 = vadd.f32 %v907_v33, %v906_v32 }
 0x12d   :  { %v909_v38 = vpop.f32.mrf.mxu0 }
 0x12e   :  { %v604_v39 = vadd.f32 %v908_v37, %v563_v34 }
 0x12f   :  { %v910_v40 = vpop.f32.mrf.mxu0 }
 0x130   :  { %v911_v42 = vadd.f32 %v910_v40, %v909_v38  ;;  %v645_v43 = vadd.f32 %v644_v21, %v604_v39 }
 0x132   :  { %v607_v44 = vadd.f32 %v911_v42, %v566_v41  ;;  %v651_v46 = vmax.f32 %v645_v43, 0.0 }
 0x134   :  { %v648_v45 = vadd.f32 %v647_v24, %v607_v44 }
 0x136   :  { %v652_v47 = vmax.f32 %v648_v45, 0.0 }
 0x138   :  { %v653_v48 = vpack.c.bf16 %v652_v47, %v651_v46 }
 0x13a   :  { %946 = vmatmul.mubr.bf16.vlgmr.msra.gmra.mxu1 %v653_v48 }
 0x1fa   :  { %v759_v50 = vpop.f32.mrf.mxu1 }
 0x1fb   :  { %v760_v51 = vadd.f32 %v837_v49, %v759_v50 }
 0x1fc   :  { %v947_v52 = vpop.f32.mrf.mxu1 }
 0x1fd   :  { %766 = vst [vmem:[#allocation8] sm:$0xff] %v760_v51 }
 0x1fe   :  { %v762_v53 = vpop.f32.mrf.mxu1 }
 0x1ff   :  { %v763_v54 = vadd.f32 %v837_v49, %v762_v53 }
 0x200   :  { %v948_v55 = vpop.f32.mrf.mxu1 }
 0x201   :  { %767 = vst [vmem:[#allocation8 + $0x8] sm:$0xff] %v763_v54 }
 0x202   :  { %1089 = shalt.err (!%p1086_p5)
}
 0x203   :  { %s1114_s15 = smov 128   ;;  %s1115_s4 = smov 8  }
 0x204   :  { %779 = dma.vmem_to_hbm [thread:$0]  %s774_s13, 256, %s1182_s5, [#allocation4], %s1114_s15, %s1114_s15, %s1115_s4  }
 0x205   :  { %1102 = dma.done.wait [#allocation4], 256  }
 0x206   :  { %1103 = vsyncadd [#allocation4], 4294967040 }
 0x207   :  { %783 = vsyncpa [#allocation3], 1 }
 0x208   :  { %784 = vsyncpa [#allocation6], 1 }
 0x209   :  { %785 = vsyncpa [#allocation4], 1 }

</bundles_post_ra>
